<compile_context>
chip_gen: v6e
topology: v6e:2x2x1
jax: 0.10.0
libtpu: 0.0.40
codegen_flags: <defaults>
</compile_context>

<pallas_src>
import functools

import jax
import jax.numpy as jnp
from jax.experimental import pallas as pl
from jax.experimental.pallas import tpu as pltpu


_LANE = 128
_TARGET_BLOCK_BYTES = 4 * 1024 * 1024     # per x/out block (double-buffered -> ~16 MiB)
_LANE_CAP = 8192                          # max lane elements per block
_VMEM_LIMIT = 40 * 1024 * 1024


def _sublane_quantum(dtype):
    return {4: 8, 2: 16, 1: 32}.get(jnp.dtype(dtype).itemsize, 8)


def _pick_tile(total, quantum, cap):
    """Tile size that is a multiple of `quantum` and <= cap, preferring an
    exact divisor of `total` (no masked edge blocks).  When no divisor exists
    the capped tile is used with a cdiv grid (Pallas masks the edge block).
    When total <= quantum, the full extent is used (always a legal block)."""
    if total <= quantum:
        return total
    cap = max(quantum, (min(cap, total) // quantum) * quantum)
    t = cap
    while t >= quantum:
        if total % t == 0:
            return t
        t -= quantum
    return cap


# ---------------------------------------------------------------------------
# Modulation kernels:  out[r, hw] = x[r, hw] * scale[r] + shift[r]
# ---------------------------------------------------------------------------
def _modulate_kernel(params_ref, x_ref, o_ref):
    # params: [TR, 2] f32, col 0 = scale (with "+1.0" already folded), col 1 = shift
    p = params_ref[...]
    scale = p[:, 0:1]
    shift = p[:, 1:2]
    xf = x_ref[...].astype(jnp.float32)
    o_ref[...] = (xf * scale + shift).astype(o_ref.dtype)


def _modulate_folded_kernel(params_ref, expand_ref, x_ref, o_ref, *, g):
    # Small-HW path: g channels folded onto the lane axis (lane width = g*HW = 128).
    # params: [TR, 2g] f32 (first g cols = scale, last g = shift)
    # expand: [g, g*HW] one-hot (E[c, c*HW:(c+1)*HW] = 1) -> lane expansion on MXU
    p = params_ref[...]
    e = expand_ref[...]
    scale = jnp.dot(p[:, :g], e, preferred_element_type=jnp.float32)
    shift = jnp.dot(p[:, g:], e, preferred_element_type=jnp.float32)
    xf = x_ref[...].astype(jnp.float32)
    o_ref[...] = (xf * scale + shift).astype(o_ref.dtype)


# ---------------------------------------------------------------------------
# Wrapper
# ---------------------------------------------------------------------------
def apply_style(x_nchw, latent, weight, bias, *, w_lrmul, b_lrmul):
    """x_nchw: [N, C, H, W], latent: [N, L], weight: [2C, L], bias: [2C]."""
    N, C, H, W = x_nchw.shape
    HW = H * W
    R = N * C
    f32 = jnp.float32

    # ---- Stage 1: tiny style FC (plain XLA by design; see header) ----------
    y = latent.astype(f32) @ (weight.astype(f32) * w_lrmul).T \
        + bias.astype(f32) * b_lrmul
    style = jnp.where(y >= 0.0, y, 0.2 * y)          # leaky_relu(0.2)
    scale = (style[:, :C] + 1.0).reshape(R)          # fold the "+1.0" here
    shift = style[:, C:].reshape(R)

    x_flat = x_nchw.reshape(R, HW)
    itemsize = x_nchw.dtype.itemsize
    q_sub = _sublane_quantum(x_nchw.dtype)

    # ---- Stage 2a: lane-folded path for small feature maps -----------------
    if HW < _LANE and (_LANE % HW == 0) and (R % (_LANE // HW) == 0):
        g = _LANE // HW
        rows = R // g
        lanes = g * HW                                # == 128: lane-dense stores
        x2 = x_flat.reshape(rows, lanes)
        params = jnp.concatenate(
            [scale.reshape(rows, g), shift.reshape(rows, g)], axis=-1)  # [rows, 2g] f32
        expand = (jnp.arange(lanes)[None, :] // HW
                  == jnp.arange(g)[:, None]).astype(f32)                # [g, 128]

        max_tr = max(q_sub, _TARGET_BLOCK_BYTES // (lanes * itemsize))
        tr = _pick_tile(rows, q_sub, max_tr)
        grid = (pl.cdiv(rows, tr),)

        out2 = pl.pallas_call(
            functools.partial(_modulate_folded_kernel, g=g),
            out_shape=jax.ShapeDtypeStruct((rows, lanes), x_flat.dtype),
            grid_spec=pltpu.PrefetchScalarGridSpec(
                num_scalar_prefetch=0,
                grid=grid,
                in_specs=[
                    pl.BlockSpec((tr, 2 * g), lambda r: (r, 0)),   # packed scale/shift
                    pl.BlockSpec((g, lanes), lambda r: (0, 0)),    # one-hot expander
                    pl.BlockSpec((tr, lanes), lambda r: (r, 0)),   # x
                ],
                out_specs=pl.BlockSpec((tr, lanes), lambda r: (r, 0)),
            ),
            compiler_params=pltpu.CompilerParams(
                dimension_semantics=("parallel",),
                vmem_limit_bytes=_VMEM_LIMIT,
            ),
        )(params, expand, x2)
        return out2.reshape(N, C, H, W)

    # ---- Stage 2b: general path (rows x spatial grid) -----------------------
    # TODO(synk): HW < 128 with 128 % HW != 0 or R % (128//HW) != 0 still emits
    # masked stores on the lane remainder; full folding would need a gather.
    params = jnp.stack([scale, shift], axis=-1)       # [R, 2] f32

    thw = _pick_tile(HW, _LANE, _LANE_CAP)
    max_tr = max(q_sub, _TARGET_BLOCK_BYTES // (thw * itemsize))
    tr = _pick_tile(R, q_sub, max_tr)
    grid = (pl.cdiv(R, tr), pl.cdiv(HW, thw))

    out_flat = pl.pallas_call(
        _modulate_kernel,
        out_shape=jax.ShapeDtypeStruct((R, HW), x_flat.dtype),
        grid_spec=pltpu.PrefetchScalarGridSpec(
            num_scalar_prefetch=0,
            grid=grid,
            in_specs=[
                pl.BlockSpec((tr, 2), lambda r, s: (r, 0)),        # packed scale/shift
                # If xprof shows exposed DMA at step boundaries on v7x, sweep
                # pipeline_mode=pl.Buffered(3) on this x spec only.
                pl.BlockSpec((tr, thw), lambda r, s: (r, s)),      # x
            ],
            out_specs=pl.BlockSpec((tr, thw), lambda r, s: (r, s)),
        ),
        compiler_params=pltpu.CompilerParams(
            dimension_semantics=("parallel", "parallel"),
            vmem_limit_bytes=_VMEM_LIMIT,
        ),
    )(params, x_flat)
    return out_flat.reshape(N, C, H, W)


def reference_apply_style(x, latent, weight, bias, *, w_lrmul, b_lrmul):
    y = latent @ (weight * w_lrmul).T + bias * b_lrmul
    style = jnp.where(y >= 0.0, y, 0.2 * y)
    N, C = x.shape[0], x.shape[1]
    style = style.reshape(N, 2, C, 1, 1)
    return x * (style[:, 0] + 1.0) + style[:, 1]


def _make_inputs(key, N, C, H, W, latent_size, init_std):
    kx, kl, kw = jax.random.split(key, 3)
    x = jax.random.normal(kx, (N, C, H, W), dtype=jnp.float32)
    latent = jax.random.normal(kl, (N, latent_size), dtype=jnp.float32)
    weight = jax.random.normal(kw, (2 * C, latent_size), dtype=jnp.float32) * init_std
    bias = jnp.zeros((2 * C,), dtype=jnp.float32)
    return x, latent, weight, bias


if __name__ == "__main__":
    latent_size = 8
    use_wscale = True          # StyleGAN default path
    gain = 1.0
    lrmul = 1.0

    # FC parameter setup (deterministic, matches the module's __init__ math).
    he_std = gain * latent_size ** (-0.5)
    if use_wscale:
        init_std = 1.0 / lrmul
        w_lrmul = he_std * lrmul
    else:
        init_std = he_std / lrmul
        w_lrmul = lrmul
    b_lrmul = lrmul

    key = jax.random.PRNGKey(0)
    cases = [
        (2, 4, 16, 16),   # primary shape (general path, HW % 128 == 0)
        (2, 8, 4, 4),     # small-HW lane-folded path (HW = 16, g = 8)
        (2, 4, 5, 5),     # non-divisible fallback (HW = 25, masked stores)
    ]
    for idx, (N, C, H, W) in enumerate(cases):
        case_key = jax.random.fold_in(key, idx)
        x, latent, weight, bias = _make_inputs(case_key, N, C, H, W,
                                               latent_size, init_std)
        out = apply_style(x, latent, weight, bias,
                          w_lrmul=w_lrmul, b_lrmul=b_lrmul)
        out = jax.block_until_ready(out)
        ref = reference_apply_style(x, latent, weight, bias,
                                    w_lrmul=w_lrmul, b_lrmul=b_lrmul)
        assert out.shape == (N, C, H, W)
        assert jnp.allclose(out, ref, atol=1e-5, rtol=1e-5)

    print("KERNEL_OK")
</pallas_src>

<mosaic_0001>
module attributes {stable_mosaic.version = 11 : i64} {
  func.func @_modulate_kernel(%arg0: i32, %arg1: i32, %arg2: memref<8x2xf32, #tpu.memory_space<vmem>>, %arg3: memref<8x256xf32, #tpu.memory_space<vmem>>, %arg4: memref<8x256xf32, #tpu.memory_space<vmem>>) attributes {dimension_semantics = [#tpu.dimension_semantics<parallel>, #tpu.dimension_semantics<parallel>], iteration_bounds = array<i64: 1, 1>, scalar_prefetch = 0 : i64, scratch_operands = 0 : i64, tpu.core_type = #tpu.core_type<tc>, window_params = [{transform_indices = @transform_0, window_bounds = array<i64: 8, 2>}, {transform_indices = @transform_1, window_bounds = array<i64: 8, 256>}, {transform_indices = @transform_2, window_bounds = array<i64: 8, 256>}]} {
    %c0 = arith.constant 0 : index
    %c0_0 = arith.constant 0 : index
    %0 = vector.load %arg2[%c0, %c0_0] : memref<8x2xf32, #tpu.memory_space<vmem>>, vector<8x2xf32>
    %1 = vector.extract_strided_slice %0 {offsets = [0, 0], sizes = [8, 1], strides = [1, 1]} : vector<8x2xf32> to vector<8x1xf32>
    %2 = vector.extract_strided_slice %0 {offsets = [0, 1], sizes = [8, 1], strides = [1, 1]} : vector<8x2xf32> to vector<8x1xf32>
    %c0_1 = arith.constant 0 : index
    %c0_2 = arith.constant 0 : index
    %3 = vector.load %arg3[%c0_1, %c0_2] : memref<8x256xf32, #tpu.memory_space<vmem>>, vector<8x256xf32>
    %4 = vector.broadcast %1 : vector<8x1xf32> to vector<8x256xf32>
    %5 = arith.mulf %3, %4 : vector<8x256xf32>
    %6 = vector.broadcast %2 : vector<8x1xf32> to vector<8x256xf32>
    %7 = arith.addf %5, %6 : vector<8x256xf32>
    %c0_3 = arith.constant 0 : index
    %c0_4 = arith.constant 0 : index
    %8 = vector.load %arg4[%c0_3, %c0_4] : memref<8x256xf32, #tpu.memory_space<vmem>>, vector<8x256xf32>
    tpu.vector_store %arg4[%c0_3, %c0_4], %7 {strides = array<i32>} : memref<8x256xf32, #tpu.memory_space<vmem>>, vector<8x256xf32>,
    return
  }
  func.func @transform_0(%arg0: i32, %arg1: i32) -> (i32, i32) {
    %c0_i32 = arith.constant 0 : i32
    %c0_i32_0 = arith.constant 0 : i32
    return %arg0, %c0_i32 : i32, i32
  }
  func.func @transform_1(%arg0: i32, %arg1: i32) -> (i32, i32) {
    %c0_i32 = arith.constant 0 : i32
    return %arg0, %arg1 : i32, i32
  }
  func.func @transform_2(%arg0: i32, %arg1: i32) -> (i32, i32) {
    %c0_i32 = arith.constant 0 : i32
    return %arg0, %arg1 : i32, i32
  }
}

</mosaic_0001>

<bundles_post_ra>
// kernel: tpu_custom_call.1
= control target key start
LH: loop header
LB: loop body
LE: loop exit
PB: predicated region body
PF: predicated region fallthrough
CT: control target
= control target key end

     0   :  { %7 = vsyncpa [#allocation3], 0  ;;  %s135_s0 = inlined_call_operand.vmem [shape: f32[8,2], index: 0, kind: input, shape index: {}]   ;;  %s136_s1 = inlined_call_operand.hbm [shape: f32[8,256], index: 1, kind: input, shape index: {}]   ;;  %s137_s2 = inlined_call_operand.hbm [shape: f32[8,256], index: 2, kind: output, shape index: {}]  }
   0x1   :  { %8 = vsyncpa [#allocation4], 0  ;;  %s107_s9 = smov [#allocation2]  }
   0x2   :  { %s17_s10 = sshll.u32 %s107_s9, 4  ;;  %s18_s10 = int_to_ptr.vmem [resolvable:$true] %s17_s10 }
   0x3   :  { %s71_s11 = scalar_lea.vmem %s18_s10, 256  ;;  %p76_p1 = scmp.lt.s32.totalorder %s18_s10, %s18_s10 }
   0x4   :  { %p72_p0 = scmp.ne.s32.totalorder %s18_s10, %s71_s11  ;;  %p77_p2 = scmp.lt.s32.totalorder %s71_s11, %s71_s11 }
   0x6   :  { %p78_p3 = por %p77_p2, %p76_p1 }
   0x8   :  { %p79_p4 = pnand %p78_p3, %p72_p0 }
   0xa   :  { %82 = shalt.err (!%p79_p4)
}
   0xb   :  { %20 = dma.hbm_to_vmem [thread:$0]  %s136_s1, 256, %s18_s10, [#allocation3]  }
   0xc   :  { %103 = dma.done.wait [#allocation3], 256  }
   0xd   :  { %104 = vsyncadd [#allocation3], 4294967040  ;;  %v108_v0 = vmov 0   ;;  %v24_v1 = vld [vmem:[%s135_s0] sm:$0xff]  ;;  %v109_v2 = vmov 1   ;;  %v26_v5 = vld [vmem:[#allocation2 + $0x8] sm:$0xff] }
   0xe   :  { %61 = vset.pattern.permute.xlu0 %v108_v0  ;;  %v25_v4 = vld [vmem:[#allocation2] sm:$0xff]  ;;  %s110_s16 = smov [#allocation5]  }
   0xf   :  { %29 = vperm.xlu0 %61, %v24_v1   ;;  %s48_s17 = sshll.u32 %s110_s16, 4  ;;  %s49_s17 = int_to_ptr.vmem [resolvable:$true] %s48_s17 }
  0x10   :  { %s83_s1 = scalar_lea.vmem %s49_s17, 256  ;;  %p88_p6 = scmp.lt.s32.totalorder %s49_s17, %s49_s17 }
  0x11   :  { %p84_p5 = scmp.ne.s32.totalorder %s49_s17, %s83_s1  ;;  %p89_p7 = scmp.lt.s32.totalorder %s83_s1, %s83_s1 }
  0x13   :  { %62 = vset.pattern.permute.xlu0 %v109_v2  ;;  %p90_p8 = por %p89_p7, %p88_p6 }
  0x14   :  { %35 = vperm.xlu0 %62, %v24_v1  }
  0x15   :  { %p91_p9 = pnand %p90_p8, %p84_p5 }
  0x8a   :  { %v30_v3 = vpop.permute.xlu0 %29 }
  0x8b   :  { %v32_v6 = vmul.f32 %v30_v3, %v25_v4  ;;  %v33_v7 = vmul.f32 %v30_v3, %v26_v5 }
  0x8f   :  { %v36_v8 = vpop.permute.xlu0 %35 }
  0x90   :  { %v38_v9 = vadd.f32 %v36_v8, %v32_v6  ;;  %v39_v10 = vadd.f32 %v36_v8, %v33_v7 }
  0x92   :  { %40 = vst [vmem:[#allocation5] sm:$0xff] %v38_v9  ;;  %41 = vst [vmem:[#allocation5 + $0x8] sm:$0xff] %v39_v10 }
  0x93   :  { %94 = shalt.err (!%p91_p9)
}
  0x94   :  { %51 = dma.vmem_to_hbm [thread:$0]  %s49_s17, 256, %s137_s2, [#allocation4]  }
  0x95   :  { %105 = dma.done.wait [#allocation4], 256  }
  0x96   :  { %106 = vsyncadd [#allocation4], 4294967040 }
  0x97   :  { %55 = vsyncpa [#allocation3], 1 }
  0x98   :  { %56 = vsyncpa [#allocation4], 1 }

</bundles_post_ra>
